<compile_context>
chip_gen: v7x
topology: tpu7x:2x2x1
jax: 0.10.0
libtpu: 0.0.40
codegen_flags: <defaults>
</compile_context>

<pallas_src>
import math
import functools

import jax
import jax.numpy as jnp
from jax.experimental import pallas as pl
from jax.experimental.pallas import tpu as pltpu

LANE = 128  # TPU lane width; per-head lane-padding target for the fused output heads.


# ----------------------------------------------------------------------------
# Kernel
# ----------------------------------------------------------------------------
def _decoder_kernel(n_layers, hidden_size,
                    p_ref, x_ref, eps_ref, hid0_ref, pe_ref,
                    wemb_ref, bemb_ref, gamma_ref, beta_ref,
                    wgx_ref, wgh_ref, bg_ref, whd_ref, bhd_ref,
                    out_ref, hid_ref):
    """One TextDecoder.forward step per grid iteration.

    Weights / pe are VMEM-resident (constant index maps).  The hidden state is
    carried across grid steps inside `hid_ref` (constant-index output block,
    aliased to the hidden input) and only written back to HBM at the end.
    """
    H = hidden_size
    t = pl.program_id(0)

    # Initialize the carried hidden state from the (aliased) input on step 0.
    @pl.when(t == 0)
    def _():
        hid_ref[...] = hid0_ref[...]

    x = x_ref[0]                       # (B, input_size)   - this step's input
    eps = eps_ref[0]                   # (B, LANE)         - zero-padded noise

    # --- emb: Linear -> LayerNorm -> LeakyReLU(0.2) ---
    h = jnp.dot(x, wemb_ref[...], preferred_element_type=jnp.float32) + bemb_ref[...]
    mean = jnp.mean(h, axis=-1, keepdims=True)
    var = jnp.mean(jnp.square(h - mean), axis=-1, keepdims=True)
    h = (h - mean) * jax.lax.rsqrt(var + 1e-5)
    h = h * gamma_ref[...] + beta_ref[...]
    x_in = jnp.where(h > 0, h, 0.2 * h)

    # --- positional encoding: pe[p0 + t], gathered in-kernel (SMEM scalar index) ---
    p = p_ref[0] + t
    x_in = x_in + pe_ref[p]            # (1, H) broadcast over batch

    # --- GRU stack (PyTorch GRUCell semantics), layers unrolled ---
    h_last = x_in
    for i in range(n_layers):
        h_prev = hid_ref[i]            # (B, H) : previous step's hidden for layer i
        # Fused gate tensor (B, 4H): columns = [r | z | n_x | n_h], one bias add.
        g = (jnp.dot(x_in, wgx_ref[i], preferred_element_type=jnp.float32)
             + jnp.dot(h_prev, wgh_ref[i], preferred_element_type=jnp.float32)
             + bg_ref[i])
        r = jax.nn.sigmoid(g[:, 0:H])
        zg = jax.nn.sigmoid(g[:, H:2 * H])
        n = jnp.tanh(g[:, 2 * H:3 * H] + r * g[:, 3 * H:4 * H])
        h_new = (1.0 - zg) * n + zg * h_prev
        hid_ref[i] = h_new
        h_last = h_new

    # --- fused heads (mu | logvar), each lane-padded to 128, + reparameterize ---
    head = jnp.dot(h_last, whd_ref[...], preferred_element_type=jnp.float32) + bhd_ref[...]
    mu = head[:, 0:LANE]
    logvar = head[:, LANE:2 * LANE]
    z = eps * jnp.exp(0.5 * logvar) + mu

    # Single lane-dense packed store: [z | mu | logvar], every piece 128-lane aligned.
    out_ref[0] = jnp.concatenate([z, mu, logvar], axis=-1)


# ----------------------------------------------------------------------------
# pallas_call wrapper (rollout over T steps in ONE kernel launch)
# ----------------------------------------------------------------------------
def _rollout_pallas(kp, p0_arr, x_seq, eps_pad, hidden):
    T, B, In = x_seq.shape
    L = kp["n_layers"]
    H = kp["hidden_size"]
    OP = LANE
    ML = kp["pe"].shape[0]

    kern = functools.partial(_decoder_kernel, L, H)

    step_3d = lambda t: (t, 0, 0)
    const2 = lambda t: (0, 0)
    const3 = lambda t: (0, 0, 0)

    in_specs = [
        pl.BlockSpec(memory_space=pltpu.MemorySpace.SMEM),     # 0: p0 scalar
        pl.BlockSpec((1, B, In), step_3d),                     # 1: x_seq (per step)
        pl.BlockSpec((1, B, OP), step_3d),                     # 2: eps (per step, padded)
        pl.BlockSpec((L, B, H), const3),                       # 3: initial hidden (aliased)
        pl.BlockSpec((ML, 1, H), const3),                      # 4: full pe table (resident)
        pl.BlockSpec((In, H), const2),                         # 5: W_emb
        pl.BlockSpec((1, H), const2),                          # 6: b_emb
        pl.BlockSpec((1, H), const2),                          # 7: ln_gamma
        pl.BlockSpec((1, H), const2),                          # 8: ln_beta
        pl.BlockSpec((L, H, 4 * H), const3),                   # 9: W_gates (x side)
        pl.BlockSpec((L, H, 4 * H), const3),                   # 10: W_gates (h side)
        pl.BlockSpec((L, 1, 4 * H), const3),                   # 11: fused gate bias
        pl.BlockSpec((H, 2 * OP), const2),                     # 12: fused head weights
        pl.BlockSpec((1, 2 * OP), const2),                     # 13: fused head bias
    ]
    out_specs = (
        pl.BlockSpec((1, B, 3 * OP), step_3d),                 # packed [z | mu | logvar]
        pl.BlockSpec((L, B, H), const3),                       # final hidden (resident)
    )
    out_shape = (
        jax.ShapeDtypeStruct((T, B, 3 * OP), jnp.float32),
        jax.ShapeDtypeStruct((L, B, H), jnp.float32),
    )

    return pl.pallas_call(
        kern,
        grid=(T,),
        in_specs=in_specs,
        out_specs=out_specs,
        out_shape=out_shape,
        input_output_aliases={3: 1},   # hidden input buffer reused for hidden output
        compiler_params=pltpu.CompilerParams(
            dimension_semantics=("arbitrary",)),
    )(p0_arr, x_seq, eps_pad, hidden,
      kp["pe"], kp["W_emb"], kp["b_emb"], kp["ln_gamma"], kp["ln_beta"],
      kp["W_gx"], kp["W_gh"], kp["b_g"], kp["W_heads"], kp["b_heads"])


def text_decoder_rollout(kp, x_seq, hidden, p0, eps_seq):
    """Runs T chained TextDecoder.forward steps (teacher-forced inputs x_seq[t],
    positions p0 + t, noise eps_seq[t]) inside a single pallas_call."""
    T, B, _ = x_seq.shape
    out = kp["out_size"]
    eps_pad = jnp.pad(eps_seq.astype(jnp.float32),
                      ((0, 0), (0, 0), (0, LANE - out)))
    p0_arr = jnp.asarray([p0], dtype=jnp.int32)
    packed, hid_final = _rollout_pallas(kp, p0_arr, x_seq.astype(jnp.float32),
                                        eps_pad, hidden.astype(jnp.float32))
    z = packed[:, :, 0:out]
    mu = packed[:, :, LANE:LANE + out]
    logvar = packed[:, :, 2 * LANE:2 * LANE + out]
    return z, mu, logvar, hid_final


def text_decoder_forward(kp, inputs, hidden, p, eps):
    """Single step, matching TextDecoder.forward(inputs, hidden, p) (+ explicit eps)."""
    z, mu, logvar, hid = text_decoder_rollout(kp, inputs[None], hidden, p, eps[None])
    return z[0], mu[0], logvar[0], hid


# ----------------------------------------------------------------------------
# Parameter construction / layout plumbing (done once, outside the kernel)
# ----------------------------------------------------------------------------
def prepare_kernel_params(params):
    """Fuse GRU gate weights into a [r | z | n_x | n_h] 4H-lane layout with one
    pre-summed bias, fuse + lane-pad the mu/logvar heads, reshape pe for dynamic
    leading-dim indexing.  Pure layout plumbing; numerics unchanged."""
    W_ih, W_hh = params["W_ih"], params["W_hh"]            # (L, H, 3H)
    b_ih, b_hh = params["b_ih"], params["b_hh"]            # (L, 1, 3H)
    L, H, _ = W_ih.shape
    out = params["W_mu"].shape[1]
    assert out <= LANE
    zero_w = jnp.zeros((L, H, H), jnp.float32)

    W_gx = jnp.concatenate(
        [W_ih[:, :, 0:H], W_ih[:, :, H:2 * H], W_ih[:, :, 2 * H:3 * H], zero_w], axis=-1)
    W_gh = jnp.concatenate(
        [W_hh[:, :, 0:H], W_hh[:, :, H:2 * H], zero_w, W_hh[:, :, 2 * H:3 * H]], axis=-1)
    b_g = jnp.concatenate(
        [b_ih[:, :, 0:H] + b_hh[:, :, 0:H],
         b_ih[:, :, H:2 * H] + b_hh[:, :, H:2 * H],
         b_ih[:, :, 2 * H:3 * H],
         b_hh[:, :, 2 * H:3 * H]], axis=-1)

    def pad_lanes(a):
        return jnp.pad(a, ((0, 0), (0, LANE - a.shape[1])))

    W_heads = jnp.concatenate([pad_lanes(params["W_mu"]), pad_lanes(params["W_lv"])], axis=-1)
    b_heads = jnp.concatenate([pad_lanes(params["b_mu"]), pad_lanes(params["b_lv"])], axis=-1)

    return {
        "pe": params["pe"][:, None, :],                     # (max_len, 1, H)
        "W_emb": params["W_emb"], "b_emb": params["b_emb"],
        "ln_gamma": params["ln_gamma"], "ln_beta": params["ln_beta"],
        "W_gx": W_gx, "W_gh": W_gh, "b_g": b_g,
        "W_heads": W_heads, "b_heads": b_heads,
        "n_layers": L, "hidden_size": H, "out_size": out,
    }


def _xavier_normal(key, fan_in, fan_out):
    std = math.sqrt(2.0 / (fan_in + fan_out))
    return std * jax.random.normal(key, (fan_in, fan_out), dtype=jnp.float32)


def make_params(key, text_size, input_size, output_size, hidden_size, n_layers, max_len=300):
    H = hidden_size
    ks = jax.random.split(key, 10)

    # Positional encoding table (buffer, not learned).
    position = jnp.arange(max_len, dtype=jnp.float32)[:, None]
    div_term = jnp.exp(jnp.arange(0, H, 2, dtype=jnp.float32) * (-math.log(10000.0) / H))
    pe = jnp.zeros((max_len, H), dtype=jnp.float32)
    pe = pe.at[:, 0::2].set(jnp.sin(position * div_term))
    pe = pe.at[:, 1::2].set(jnp.cos(position * div_term))

    # GRUCell weights (deterministic normal init; exact distribution doesn't affect semantics).
    g_std = 1.0 / math.sqrt(H)
    w_ih = g_std * jax.random.normal(ks[4], (n_layers, H, 3 * H), dtype=jnp.float32)
    w_hh = g_std * jax.random.normal(ks[5], (n_layers, H, 3 * H), dtype=jnp.float32)
    b_ih = g_std * jax.random.normal(ks[6], (n_layers, 1, 3 * H), dtype=jnp.float32)
    b_hh = g_std * jax.random.normal(ks[7], (n_layers, 1, 3 * H), dtype=jnp.float32)

    return {
        "pe": pe,
        "W_emb": _xavier_normal(ks[0], input_size, H),
        "b_emb": jnp.zeros((1, H), jnp.float32),
        "ln_gamma": jnp.ones((1, H), jnp.float32),
        "ln_beta": jnp.zeros((1, H), jnp.float32),
        "W_ih": w_ih, "W_hh": w_hh, "b_ih": b_ih, "b_hh": b_hh,
        "W_z2init": _xavier_normal(ks[1], text_size, H * n_layers),
        "b_z2init": jnp.zeros((1, H * n_layers), jnp.float32),
        "W_mu": _xavier_normal(ks[2], H, output_size),
        "b_mu": jnp.zeros((1, output_size), jnp.float32),
        "W_lv": _xavier_normal(ks[3], H, output_size),
        "b_lv": jnp.zeros((1, output_size), jnp.float32),
    }


def get_init_hidden(params, latent):
    """z2init linear + split (plain-JAX glue, matches TextDecoder.get_init_hidden)."""
    h = jnp.dot(latent, params["W_z2init"],
                precision=jax.lax.Precision.HIGHEST) + params["b_z2init"]
    n_layers = params["W_ih"].shape[0]
    return jnp.stack(jnp.split(h, n_layers, axis=-1), axis=0)  # (n_layers, B, H)


# ----------------------------------------------------------------------------
# Pure-JAX reference (original, unfused weight layout) for correctness checking
# ----------------------------------------------------------------------------
def reference_step(params, x, hidden, p, eps):
    H = params["W_emb"].shape[1]
    L = params["W_ih"].shape[0]
    hp = jax.lax.Precision.HIGHEST
    h = jnp.dot(x, params["W_emb"], precision=hp) + params["b_emb"]
    mean = jnp.mean(h, axis=-1, keepdims=True)
    var = jnp.mean(jnp.square(h - mean), axis=-1, keepdims=True)
    h = (h - mean) * jax.lax.rsqrt(var + 1e-5)
    h = h * params["ln_gamma"] + params["ln_beta"]
    x_in = jnp.where(h > 0, h, 0.2 * h)
    x_in = x_in + params["pe"][p][None, :]
    new_hidden = []
    h_last = x_in
    for i in range(L):
        h_prev = hidden[i]
        gi = jnp.dot(x_in, params["W_ih"][i], precision=hp) + params["b_ih"][i]
        gh = jnp.dot(h_prev, params["W_hh"][i], precision=hp) + params["b_hh"][i]
        r = jax.nn.sigmoid(gi[:, 0:H] + gh[:, 0:H])
        z = jax.nn.sigmoid(gi[:, H:2 * H] + gh[:, H:2 * H])
        n = jnp.tanh(gi[:, 2 * H:3 * H] + r * gh[:, 2 * H:3 * H])
        h_new = (1.0 - z) * n + z * h_prev
        new_hidden.append(h_new)
        h_last = h_new
    mu = jnp.dot(h_last, params["W_mu"], precision=hp) + params["b_mu"]
    logvar = jnp.dot(h_last, params["W_lv"], precision=hp) + params["b_lv"]
    zz = eps * jnp.exp(0.5 * logvar) + mu
    return zz, mu, logvar, jnp.stack(new_hidden, axis=0)


# ----------------------------------------------------------------------------
if __name__ == "__main__":
    key = jax.random.PRNGKey(0)
    k_param, k_x, k_lat, k_eps = jax.random.split(key, 4)

    text_size, input_size, output_size, hidden_size, n_layers = 24, 16, 12, 32, 2
    B, T, p0 = 8, 8, 3   # B=8 fills the 8-sublane vreg dimension (perf feedback).

    params = make_params(k_param, text_size, input_size, output_size, hidden_size, n_layers)
    kparams = prepare_kernel_params(params)

    x_seq = jax.random.normal(k_x, (T, B, input_size), dtype=jnp.float32)
    eps_seq = jax.random.normal(k_eps, (T, B, output_size), dtype=jnp.float32)
    latent = jax.random.normal(k_lat, (B, text_size), dtype=jnp.float32)

    # Pure-JAX reference: T chained module.forward steps.
    ref_z, ref_mu, ref_lv, ref_hid = [], [], [], []
    h_cur = get_init_hidden(params, latent)
    for t in range(T):
        z_t, mu_t, lv_t, h_cur = reference_step(params, x_seq[t], h_cur, p0 + t, eps_seq[t])
        ref_z.append(z_t); ref_mu.append(mu_t); ref_lv.append(lv_t); ref_hid.append(h_cur)
    ref_z = jnp.stack(ref_z); ref_mu = jnp.stack(ref_mu); ref_lv = jnp.stack(ref_lv)

    # Fused multi-step rollout: ONE pallas_call, grid over the T decode steps.
    z_seq, mu_seq, lv_seq, hid_final = text_decoder_rollout(
        kparams, x_seq, get_init_hidden(params, latent), p0, eps_seq)

    # Single-step forward (module-equivalent API) through the same kernel (T=1).
    z0, mu0, lv0, hid1 = text_decoder_forward(
        kparams, x_seq[0], get_init_hidden(params, latent), p0, eps_seq[0])

    jax.block_until_ready((z_seq, mu_seq, lv_seq, hid_final, z0, mu0, lv0, hid1))

    # Shape checks.
    assert z_seq.shape == (T, B, output_size)
    assert mu_seq.shape == (T, B, output_size)
    assert lv_seq.shape == (T, B, output_size)
    assert hid_final.shape == (n_layers, B, hidden_size)
    assert z0.shape == (B, output_size) and mu0.shape == (B, output_size)
    assert lv0.shape == (B, output_size) and hid1.shape == (n_layers, B, hidden_size)

    # Numerical checks vs. the pure-JAX reference.
    def close(a, b):
        return bool(jnp.allclose(a, b, rtol=1e-2, atol=1e-2))

    assert close(z_seq, ref_z) and close(mu_seq, ref_mu) and close(lv_seq, ref_lv)
    assert close(hid_final, ref_hid[-1])
    assert close(z0, ref_z[0]) and close(mu0, ref_mu[0]) and close(lv0, ref_lv[0])
    assert close(hid1, ref_hid[0])

    print("KERNEL_OK")
</pallas_src>

<mosaic_0001>
module attributes {stable_mosaic.version = 11 : i64} {
  func.func @_decoder_kernel(%arg0: i32, %arg1: memref<1xi32, #tpu.memory_space<smem>>, %arg2: memref<1x8x16xf32, #tpu.memory_space<vmem>>, %arg3: memref<1x8x128xf32, #tpu.memory_space<vmem>>, %arg4: memref<2x8x32xf32, #tpu.memory_space<vmem>>, %arg5: memref<300x1x32xf32, #tpu.memory_space<vmem>>, %arg6: memref<16x32xf32, #tpu.memory_space<vmem>>, %arg7: memref<1x32xf32, #tpu.memory_space<vmem>>, %arg8: memref<1x32xf32, #tpu.memory_space<vmem>>, %arg9: memref<1x32xf32, #tpu.memory_space<vmem>>, %arg10: memref<2x32x128xf32, #tpu.memory_space<vmem>>, %arg11: memref<2x32x128xf32, #tpu.memory_space<vmem>>, %arg12: memref<2x1x128xf32, #tpu.memory_space<vmem>>, %arg13: memref<32x256xf32, #tpu.memory_space<vmem>>, %arg14: memref<1x256xf32, #tpu.memory_space<vmem>>, %arg15: memref<1x8x384xf32, #tpu.memory_space<vmem>>, %arg16: memref<2x8x32xf32, #tpu.memory_space<vmem>>) attributes {dimension_semantics = [#tpu.dimension_semantics<arbitrary>], iteration_bounds = array<i64: 8>, scalar_prefetch = 0 : i64, scratch_operands = 0 : i64, tpu.core_type = #tpu.core_type<tc>, window_params = [{transform_indices = @transform_0, window_bounds = array<i64: 1>}, {transform_indices = @transform_1, window_bounds = array<i64: 1, 8, 16>}, {transform_indices = @transform_2, window_bounds = array<i64: 1, 8, 128>}, {pipeline_mode = #tpu.pipeline_mode<synchronous>, transform_indices = @transform_3, window_bounds = array<i64: 2, 8, 32>}, {pipeline_mode = #tpu.pipeline_mode<synchronous>, transform_indices = @transform_4, window_bounds = array<i64: 300, 1, 32>}, {pipeline_mode = #tpu.pipeline_mode<synchronous>, transform_indices = @transform_5, window_bounds = array<i64: 16, 32>}, {pipeline_mode = #tpu.pipeline_mode<synchronous>, transform_indices = @transform_6, window_bounds = array<i64: 1, 32>}, {pipeline_mode = #tpu.pipeline_mode<synchronous>, transform_indices = @transform_7, window_bounds = array<i64: 1, 32>}, {pipeline_mode = #tpu.pipeline_mode<synchronous>, transform_indices = @transform_8, window_bounds = array<i64: 1, 32>}, {pipeline_mode = #tpu.pipeline_mode<synchronous>, transform_indices = @transform_9, window_bounds = array<i64: 2, 32, 128>}, {pipeline_mode = #tpu.pipeline_mode<synchronous>, transform_indices = @transform_10, window_bounds = array<i64: 2, 32, 128>}, {pipeline_mode = #tpu.pipeline_mode<synchronous>, transform_indices = @transform_11, window_bounds = array<i64: 2, 1, 128>}, {pipeline_mode = #tpu.pipeline_mode<synchronous>, transform_indices = @transform_12, window_bounds = array<i64: 32, 256>}, {pipeline_mode = #tpu.pipeline_mode<synchronous>, transform_indices = @transform_13, window_bounds = array<i64: 1, 256>}, {transform_indices = @transform_14, window_bounds = array<i64: 1, 8, 384>}, {pipeline_mode = #tpu.pipeline_mode<synchronous>, transform_indices = @transform_15, window_bounds = array<i64: 2, 8, 32>}]} {
    %c0_i32 = arith.constant 0 : i32
    %0 = arith.cmpi eq, %arg0, %c0_i32 : i32
    %1 = arith.extui %0 : i1 to i32
    %c0_i32_0 = arith.constant 0 : i32
    %2 = arith.cmpi ne, %1, %c0_i32_0 : i32
    scf.if %2 {
      %c0_72 = arith.constant 0 : index
      %c0_73 = arith.constant 0 : index
      %c0_74 = arith.constant 0 : index
      %140 = vector.load %arg4[%c0_72, %c0_73, %c0_74] : memref<2x8x32xf32, #tpu.memory_space<vmem>>, vector<2x8x32xf32>
      %c0_75 = arith.constant 0 : index
      %c0_76 = arith.constant 0 : index
      %c0_77 = arith.constant 0 : index
      %141 = vector.load %arg16[%c0_75, %c0_76, %c0_77] : memref<2x8x32xf32, #tpu.memory_space<vmem>>, vector<2x8x32xf32>
      tpu.vector_store %arg16[%c0_75, %c0_76, %c0_77], %140 {strides = array<i32>} : memref<2x8x32xf32, #tpu.memory_space<vmem>>, vector<2x8x32xf32>,
    } else {
    }
    %c0 = arith.constant 0 : index
    %c0_1 = arith.constant 0 : index
    %c0_2 = arith.constant 0 : index
    %3 = vector.load %arg2[%c0, %c0_1, %c0_2] : memref<1x8x16xf32, #tpu.memory_space<vmem>>, vector<1x8x16xf32>
    %4 = vector.shape_cast %3 : vector<1x8x16xf32> to vector<8x16xf32>
    %c0_3 = arith.constant 0 : index
    %c0_4 = arith.constant 0 : index
    %c0_5 = arith.constant 0 : index
    %5 = vector.load %arg3[%c0_3, %c0_4, %c0_5] : memref<1x8x128xf32, #tpu.memory_space<vmem>>, vector<1x8x128xf32>
    %6 = vector.shape_cast %5 : vector<1x8x128xf32> to vector<8x128xf32>
    %c0_6 = arith.constant 0 : index
    %c0_7 = arith.constant 0 : index
    %7 = vector.load %arg6[%c0_6, %c0_7] : memref<16x32xf32, #tpu.memory_space<vmem>>, vector<16x32xf32>
    %cst = arith.constant dense<0.000000e+00> : vector<8x32xf32>
    %8 = tpu.matmul %4, %7, %cst {dimension_numbers = #tpu.dot_dimension_numbers<[1], [0], [0], [1], [0, 0, 1, 1], [], []>} : vector<8x16xf32>, vector<16x32xf32>, vector<8x32xf32> -> vector<8x32xf32>
    %c0_8 = arith.constant 0 : index
    %c0_9 = arith.constant 0 : index
    %9 = vector.load %arg7[%c0_8, %c0_9] : memref<1x32xf32, #tpu.memory_space<vmem>>, vector<1x32xf32>
    %10 = vector.broadcast %9 : vector<1x32xf32> to vector<8x32xf32>
    %11 = arith.addf %8, %10 : vector<8x32xf32>
    %cst_10 = arith.constant dense<0.000000e+00> : vector<8xf32>
    %12 = vector.multi_reduction <add>, %11, %cst_10 [1] : vector<8x32xf32> to vector<8xf32>
    %13 = vector.shape_cast %12 : vector<8xf32> to vector<8x1xf32>
    %cst_11 = arith.constant 3.200000e+01 : f32
    %14 = vector.broadcast %cst_11 : f32 to vector<8x1xf32>
    %15 = arith.divf %13, %14 : vector<8x1xf32>
    %16 = vector.broadcast %15 : vector<8x1xf32> to vector<8x32xf32>
    %17 = arith.subf %11, %16 : vector<8x32xf32>
    %18 = arith.mulf %17, %17 : vector<8x32xf32>
    %cst_12 = arith.constant dense<0.000000e+00> : vector<8xf32>
    %19 = vector.multi_reduction <add>, %18, %cst_12 [1] : vector<8x32xf32> to vector<8xf32>
    %20 = vector.shape_cast %19 : vector<8xf32> to vector<8x1xf32>
    %cst_13 = arith.constant 3.200000e+01 : f32
    %21 = vector.broadcast %cst_13 : f32 to vector<8x1xf32>
    %22 = arith.divf %20, %21 : vector<8x1xf32>
    %23 = vector.broadcast %15 : vector<8x1xf32> to vector<8x32xf32>
    %24 = arith.subf %11, %23 : vector<8x32xf32>
    %cst_14 = arith.constant 9.99999974E-6 : f32
    %25 = vector.broadcast %cst_14 : f32 to vector<8x1xf32>
    %26 = arith.addf %22, %25 : vector<8x1xf32>
    %27 = math.rsqrt %26 : vector<8x1xf32>
    %28 = vector.broadcast %27 : vector<8x1xf32> to vector<8x32xf32>
    %29 = arith.mulf %24, %28 : vector<8x32xf32>
    %c0_15 = arith.constant 0 : index
    %c0_16 = arith.constant 0 : index
    %30 = vector.load %arg8[%c0_15, %c0_16] : memref<1x32xf32, #tpu.memory_space<vmem>>, vector<1x32xf32>
    %31 = vector.broadcast %30 : vector<1x32xf32> to vector<8x32xf32>
    %32 = arith.mulf %29, %31 : vector<8x32xf32>
    %c0_17 = arith.constant 0 : index
    %c0_18 = arith.constant 0 : index
    %33 = vector.load %arg9[%c0_17, %c0_18] : memref<1x32xf32, #tpu.memory_space<vmem>>, vector<1x32xf32>
    %34 = vector.broadcast %33 : vector<1x32xf32> to vector<8x32xf32>
    %35 = arith.addf %32, %34 : vector<8x32xf32>
    %cst_19 = arith.constant 0.000000e+00 : f32
    %36 = vector.broadcast %cst_19 : f32 to vector<8x32xf32>
    %37 = arith.cmpf ogt, %35, %36 : vector<8x32xf32>
    %cst_20 = arith.constant 2.000000e-01 : f32
    %38 = vector.broadcast %cst_20 : f32 to vector<8x32xf32>
    %39 = arith.mulf %38, %35 : vector<8x32xf32>
    %40 = arith.select %37, %35, %39 : vector<8x32xi1>, vector<8x32xf32>
    %c0_21 = arith.constant 0 : index
    %41 = memref.load %arg1[%c0_21] : memref<1xi32, #tpu.memory_space<smem>>
    %42 = arith.addi %41, %arg0 : i32
    %43 = arith.index_cast %42 : i32 to index
    %c0_22 = arith.constant 0 : index
    %c0_23 = arith.constant 0 : index
    %44 = vector.load %arg5[%43, %c0_22, %c0_23] : memref<300x1x32xf32, #tpu.memory_space<vmem>>, vector<1x1x32xf32>
    %45 = vector.shape_cast %44 : vector<1x1x32xf32> to vector<1x32xf32>
    %46 = vector.broadcast %45 : vector<1x32xf32> to vector<8x32xf32>
    %47 = arith.addf %40, %46 : vector<8x32xf32>
    %c0_24 = arith.constant 0 : index
    %c0_25 = arith.constant 0 : index
    %c0_26 = arith.constant 0 : index
    %48 = vector.load %arg16[%c0_24, %c0_25, %c0_26] : memref<2x8x32xf32, #tpu.memory_space<vmem>>, vector<1x8x32xf32>
    %49 = vector.shape_cast %48 : vector<1x8x32xf32> to vector<8x32xf32>
    %c0_27 = arith.constant 0 : index
    %c0_28 = arith.constant 0 : index
    %c0_29 = arith.constant 0 : index
    %50 = vector.load %arg10[%c0_27, %c0_28, %c0_29] : memref<2x32x128xf32, #tpu.memory_space<vmem>>, vector<1x32x128xf32>
    %51 = vector.shape_cast %50 : vector<1x32x128xf32> to vector<32x128xf32>
    %cst_30 = arith.constant dense<0.000000e+00> : vector<8x128xf32>
    %52 = tpu.matmul %47, %51, %cst_30 {dimension_numbers = #tpu.dot_dimension_numbers<[1], [0], [0], [1], [0, 0, 1, 1], [], []>} : vector<8x32xf32>, vector<32x128xf32>, vector<8x128xf32> -> vector<8x128xf32>
    %c0_31 = arith.constant 0 : index
    %c0_32 = arith.constant 0 : index
    %c0_33 = arith.constant 0 : index
    %53 = vector.load %arg11[%c0_31, %c0_32, %c0_33] : memref<2x32x128xf32, #tpu.memory_space<vmem>>, vector<1x32x128xf32>
    %54 = vector.shape_cast %53 : vector<1x32x128xf32> to vector<32x128xf32>
    %cst_34 = arith.constant dense<0.000000e+00> : vector<8x128xf32>
    %55 = tpu.matmul %49, %54, %cst_34 {dimension_numbers = #tpu.dot_dimension_numbers<[1], [0], [0], [1], [0, 0, 1, 1], [], []>} : vector<8x32xf32>, vector<32x128xf32>, vector<8x128xf32> -> vector<8x128xf32>
    %56 = arith.addf %52, %55 : vector<8x128xf32>
    %c0_35 = arith.constant 0 : index
    %c0_36 = arith.constant 0 : index
    %c0_37 = arith.constant 0 : index
    %57 = vector.load %arg12[%c0_35, %c0_36, %c0_37] : memref<2x1x128xf32, #tpu.memory_space<vmem>>, vector<1x1x128xf32>
    %58 = vector.shape_cast %57 : vector<1x1x128xf32> to vector<1x128xf32>
    %59 = vector.broadcast %58 : vector<1x128xf32> to vector<8x128xf32>
    %60 = arith.addf %56, %59 : vector<8x128xf32>
    %61 = vector.extract_strided_slice %60 {offsets = [0, 0], sizes = [8, 32], strides = [1, 1]} : vector<8x128xf32> to vector<8x32xf32>
    %62 = arith.negf %61 : vector<8x32xf32>
    %63 = math.exp %62 : vector<8x32xf32>
    %cst_38 = arith.constant 1.000000e+00 : f32
    %64 = vector.broadcast %cst_38 : f32 to vector<8x32xf32>
    %65 = arith.addf %64, %63 : vector<8x32xf32>
    %66 = arith.divf %64, %65 : vector<8x32xf32>
    %67 = vector.extract_strided_slice %60 {offsets = [0, 32], sizes = [8, 32], strides = [1, 1]} : vector<8x128xf32> to vector<8x32xf32>
    %68 = arith.negf %67 : vector<8x32xf32>
    %69 = math.exp %68 : vector<8x32xf32>
    %cst_39 = arith.constant 1.000000e+00 : f32
    %70 = vector.broadcast %cst_39 : f32 to vector<8x32xf32>
    %71 = arith.addf %70, %69 : vector<8x32xf32>
    %72 = arith.divf %70, %71 : vector<8x32xf32>
    %73 = vector.extract_strided_slice %60 {offsets = [0, 64], sizes = [8, 32], strides = [1, 1]} : vector<8x128xf32> to vector<8x32xf32>
    %74 = vector.extract_strided_slice %60 {offsets = [0, 96], sizes = [8, 32], strides = [1, 1]} : vector<8x128xf32> to vector<8x32xf32>
    %75 = arith.mulf %66, %74 : vector<8x32xf32>
    %76 = arith.addf %73, %75 : vector<8x32xf32>
    %77 = math.tanh %76 : vector<8x32xf32>
    %cst_40 = arith.constant 1.000000e+00 : f32
    %78 = vector.broadcast %cst_40 : f32 to vector<8x32xf32>
    %79 = arith.subf %78, %72 : vector<8x32xf32>
    %80 = arith.mulf %79, %77 : vector<8x32xf32>
    %81 = arith.mulf %72, %49 : vector<8x32xf32>
    %82 = arith.addf %80, %81 : vector<8x32xf32>
    %c0_41 = arith.constant 0 : index
    %c0_42 = arith.constant 0 : index
    %c0_43 = arith.constant 0 : index
    %83 = vector.load %arg16[%c0_41, %c0_42, %c0_43] : memref<2x8x32xf32, #tpu.memory_space<vmem>>, vector<1x8x32xf32>
    %84 = vector.shape_cast %83 : vector<1x8x32xf32> to vector<8x32xf32>
    %85 = vector.shape_cast %82 : vector<8x32xf32> to vector<1x8x32xf32>
    tpu.vector_store %arg16[%c0_41, %c0_42, %c0_43], %85 {strides = array<i32>} : memref<2x8x32xf32, #tpu.memory_space<vmem>>, vector<1x8x32xf32>,
    %c1 = arith.constant 1 : index
    %c0_44 = arith.constant 0 : index
    %c0_45 = arith.constant 0 : index
    %86 = vector.load %arg16[%c1, %c0_44, %c0_45] : memref<2x8x32xf32, #tpu.memory_space<vmem>>, vector<1x8x32xf32>
    %87 = vector.shape_cast %86 : vector<1x8x32xf32> to vector<8x32xf32>
    %c1_46 = arith.constant 1 : index
    %c0_47 = arith.constant 0 : index
    %c0_48 = arith.constant 0 : index
    %88 = vector.load %arg10[%c1_46, %c0_47, %c0_48] : memref<2x32x128xf32, #tpu.memory_space<vmem>>, vector<1x32x128xf32>
    %89 = vector.shape_cast %88 : vector<1x32x128xf32> to vector<32x128xf32>
    %cst_49 = arith.constant dense<0.000000e+00> : vector<8x128xf32>
    %90 = tpu.matmul %47, %89, %cst_49 {dimension_numbers = #tpu.dot_dimension_numbers<[1], [0], [0], [1], [0, 0, 1, 1], [], []>} : vector<8x32xf32>, vector<32x128xf32>, vector<8x128xf32> -> vector<8x128xf32>
    %c1_50 = arith.constant 1 : index
    %c0_51 = arith.constant 0 : index
    %c0_52 = arith.constant 0 : index
    %91 = vector.load %arg11[%c1_50, %c0_51, %c0_52] : memref<2x32x128xf32, #tpu.memory_space<vmem>>, vector<1x32x128xf32>
    %92 = vector.shape_cast %91 : vector<1x32x128xf32> to vector<32x128xf32>
    %cst_53 = arith.constant dense<0.000000e+00> : vector<8x128xf32>
    %93 = tpu.matmul %87, %92, %cst_53 {dimension_numbers = #tpu.dot_dimension_numbers<[1], [0], [0], [1], [0, 0, 1, 1], [], []>} : vector<8x32xf32>, vector<32x128xf32>, vector<8x128xf32> -> vector<8x128xf32>
    %94 = arith.addf %90, %93 : vector<8x128xf32>
    %c1_54 = arith.constant 1 : index
    %c0_55 = arith.constant 0 : index
    %c0_56 = arith.constant 0 : index
    %95 = vector.load %arg12[%c1_54, %c0_55, %c0_56] : memref<2x1x128xf32, #tpu.memory_space<vmem>>, vector<1x1x128xf32>
    %96 = vector.shape_cast %95 : vector<1x1x128xf32> to vector<1x128xf32>
    %97 = vector.broadcast %96 : vector<1x128xf32> to vector<8x128xf32>
    %98 = arith.addf %94, %97 : vector<8x128xf32>
    %99 = vector.extract_strided_slice %98 {offsets = [0, 0], sizes = [8, 32], strides = [1, 1]} : vector<8x128xf32> to vector<8x32xf32>
    %100 = arith.negf %99 : vector<8x32xf32>
    %101 = math.exp %100 : vector<8x32xf32>
    %cst_57 = arith.constant 1.000000e+00 : f32
    %102 = vector.broadcast %cst_57 : f32 to vector<8x32xf32>
    %103 = arith.addf %102, %101 : vector<8x32xf32>
    %104 = arith.divf %102, %103 : vector<8x32xf32>
    %105 = vector.extract_strided_slice %98 {offsets = [0, 32], sizes = [8, 32], strides = [1, 1]} : vector<8x128xf32> to vector<8x32xf32>
    %106 = arith.negf %105 : vector<8x32xf32>
    %107 = math.exp %106 : vector<8x32xf32>
    %cst_58 = arith.constant 1.000000e+00 : f32
    %108 = vector.broadcast %cst_58 : f32 to vector<8x32xf32>
    %109 = arith.addf %108, %107 : vector<8x32xf32>
    %110 = arith.divf %108, %109 : vector<8x32xf32>
    %111 = vector.extract_strided_slice %98 {offsets = [0, 64], sizes = [8, 32], strides = [1, 1]} : vector<8x128xf32> to vector<8x32xf32>
    %112 = vector.extract_strided_slice %98 {offsets = [0, 96], sizes = [8, 32], strides = [1, 1]} : vector<8x128xf32> to vector<8x32xf32>
    %113 = arith.mulf %104, %112 : vector<8x32xf32>
    %114 = arith.addf %111, %113 : vector<8x32xf32>
    %115 = math.tanh %114 : vector<8x32xf32>
    %cst_59 = arith.constant 1.000000e+00 : f32
    %116 = vector.broadcast %cst_59 : f32 to vector<8x32xf32>
    %117 = arith.subf %116, %110 : vector<8x32xf32>
    %118 = arith.mulf %117, %115 : vector<8x32xf32>
    %119 = arith.mulf %110, %87 : vector<8x32xf32>
    %120 = arith.addf %118, %119 : vector<8x32xf32>
    %c1_60 = arith.constant 1 : index
    %c0_61 = arith.constant 0 : index
    %c0_62 = arith.constant 0 : index
    %121 = vector.load %arg16[%c1_60, %c0_61, %c0_62] : memref<2x8x32xf32, #tpu.memory_space<vmem>>, vector<1x8x32xf32>
    %122 = vector.shape_cast %121 : vector<1x8x32xf32> to vector<8x32xf32>
    %123 = vector.shape_cast %120 : vector<8x32xf32> to vector<1x8x32xf32>
    tpu.vector_store %arg16[%c1_60, %c0_61, %c0_62], %123 {strides = array<i32>} : memref<2x8x32xf32, #tpu.memory_space<vmem>>, vector<1x8x32xf32>,
    %c0_63 = arith.constant 0 : index
    %c0_64 = arith.constant 0 : index
    %124 = vector.load %arg13[%c0_63, %c0_64] : memref<32x256xf32, #tpu.memory_space<vmem>>, vector<32x256xf32>
    %cst_65 = arith.constant dense<0.000000e+00> : vector<8x256xf32>
    %125 = tpu.matmul %120, %124, %cst_65 {dimension_numbers = #tpu.dot_dimension_numbers<[1], [0], [0], [1], [0, 0, 1, 1], [], []>} : vector<8x32xf32>, vector<32x256xf32>, vector<8x256xf32> -> vector<8x256xf32>
    %c0_66 = arith.constant 0 : index
    %c0_67 = arith.constant 0 : index
    %126 = vector.load %arg14[%c0_66, %c0_67] : memref<1x256xf32, #tpu.memory_space<vmem>>, vector<1x256xf32>
    %127 = vector.broadcast %126 : vector<1x256xf32> to vector<8x256xf32>
    %128 = arith.addf %125, %127 : vector<8x256xf32>
    %129 = vector.extract_strided_slice %128 {offsets = [0, 0], sizes = [8, 128], strides = [1, 1]} : vector<8x256xf32> to vector<8x128xf32>
    %130 = vector.extract_strided_slice %128 {offsets = [0, 128], sizes = [8, 128], strides = [1, 1]} : vector<8x256xf32> to vector<8x128xf32>
    %cst_68 = arith.constant 5.000000e-01 : f32
    %131 = vector.broadcast %cst_68 : f32 to vector<8x128xf32>
    %132 = arith.mulf %131, %130 : vector<8x128xf32>
    %133 = math.exp %132 : vector<8x128xf32>
    %134 = arith.mulf %6, %133 : vector<8x128xf32>
    %135 = arith.addf %134, %129 : vector<8x128xf32>
    %136 = tpu.concatenate %135, %129, %130 in 1 : vector<8x128xf32>, vector<8x128xf32>, vector<8x128xf32> -> vector<8x384xf32>
    %c0_69 = arith.constant 0 : index
    %c0_70 = arith.constant 0 : index
    %c0_71 = arith.constant 0 : index
    %137 = vector.load %arg15[%c0_69, %c0_70, %c0_71] : memref<1x8x384xf32, #tpu.memory_space<vmem>>, vector<1x8x384xf32>
    %138 = vector.shape_cast %137 : vector<1x8x384xf32> to vector<8x384xf32>
    %139 = vector.shape_cast %136 : vector<8x384xf32> to vector<1x8x384xf32>
    tpu.vector_store %arg15[%c0_69, %c0_70, %c0_71], %139 {strides = array<i32>} : memref<1x8x384xf32, #tpu.memory_space<vmem>>, vector<1x8x384xf32>,
    return
  }
  func.func @transform_0(%arg0: i32) -> i32 {
    %c0_i32 = arith.constant 0 : i32
    %c0_i32_0 = arith.constant 0 : i32
    return %c0_i32 : i32
  }
  func.func @transform_1(%arg0: i32) -> (i32, i32, i32) {
    %c0_i32 = arith.constant 0 : i32
    %c0_i32_0 = arith.constant 0 : i32
    %c0_i32_1 = arith.constant 0 : i32
    return %arg0, %c0_i32, %c0_i32_0 : i32, i32, i32
  }
  func.func @transform_2(%arg0: i32) -> (i32, i32, i32) {
    %c0_i32 = arith.constant 0 : i32
    %c0_i32_0 = arith.constant 0 : i32
    %c0_i32_1 = arith.constant 0 : i32
    return %arg0, %c0_i32, %c0_i32_0 : i32, i32, i32
  }
  func.func @transform_3(%arg0: i32) -> (i32, i32, i32) {
    %c0_i32 = arith.constant 0 : i32
    %c0_i32_0 = arith.constant 0 : i32
    %c0_i32_1 = arith.constant 0 : i32
    %c0_i32_2 = arith.constant 0 : i32
    return %c0_i32, %c0_i32_0, %c0_i32_1 : i32, i32, i32
  }
  func.func @transform_4(%arg0: i32) -> (i32, i32, i32) {
    %c0_i32 = arith.constant 0 : i32
    %c0_i32_0 = arith.constant 0 : i32
    %c0_i32_1 = arith.constant 0 : i32
    %c0_i32_2 = arith.constant 0 : i32
    return %c0_i32, %c0_i32_0, %c0_i32_1 : i32, i32, i32
  }
  func.func @transform_5(%arg0: i32) -> (i32, i32) {
    %c0_i32 = arith.constant 0 : i32
    %c0_i32_0 = arith.constant 0 : i32
    %c0_i32_1 = arith.constant 0 : i32
    return %c0_i32, %c0_i32_0 : i32, i32
  }
  func.func @transform_6(%arg0: i32) -> (i32, i32) {
    %c0_i32 = arith.constant 0 : i32
    %c0_i32_0 = arith.constant 0 : i32
    %c0_i32_1 = arith.constant 0 : i32
    return %c0_i32, %c0_i32_0 : i32, i32
  }
  func.func @transform_7(%arg0: i32) -> (i32, i32) {
    %c0_i32 = arith.constant 0 : i32
    %c0_i32_0 = arith.constant 0 : i32
    %c0_i32_1 = arith.constant 0 : i32
    return %c0_i32, %c0_i32_0 : i32, i32
  }
  func.func @transform_8(%arg0: i32) -> (i32, i32) {
    %c0_i32 = arith.constant 0 : i32
    %c0_i32_0 = arith.constant 0 : i32
    %c0_i32_1 = arith.constant 0 : i32
    return %c0_i32, %c0_i32_0 : i32, i32
  }
  func.func @transform_9(%arg0: i32) -> (i32, i32, i32) {
    %c0_i32 = arith.constant 0 : i32
    %c0_i32_0 = arith.constant 0 : i32
    %c0_i32_1 = arith.constant 0 : i32
    %c0_i32_2 = arith.constant 0 : i32
    return %c0_i32, %c0_i32_0, %c0_i32_1 : i32, i32, i32
  }
  func.func @transform_10(%arg0: i32) -> (i32, i32, i32) {
    %c0_i32 = arith.constant 0 : i32
    %c0_i32_0 = arith.constant 0 : i32
    %c0_i32_1 = arith.constant 0 : i32
    %c0_i32_2 = arith.constant 0 : i32
    return %c0_i32, %c0_i32_0, %c0_i32_1 : i32, i32, i32
  }
  func.func @transform_11(%arg0: i32) -> (i32, i32, i32) {
    %c0_i32 = arith.constant 0 : i32
    %c0_i32_0 = arith.constant 0 : i32
    %c0_i32_1 = arith.constant 0 : i32
    %c0_i32_2 = arith.constant 0 : i32
    return %c0_i32, %c0_i32_0, %c0_i32_1 : i32, i32, i32
  }
  func.func @transform_12(%arg0: i32) -> (i32, i32) {
    %c0_i32 = arith.constant 0 : i32
    %c0_i32_0 = arith.constant 0 : i32
    %c0_i32_1 = arith.constant 0 : i32
    return %c0_i32, %c0_i32_0 : i32, i32
  }
  func.func @transform_13(%arg0: i32) -> (i32, i32) {
    %c0_i32 = arith.constant 0 : i32
    %c0_i32_0 = arith.constant 0 : i32
    %c0_i32_1 = arith.constant 0 : i32
    return %c0_i32, %c0_i32_0 : i32, i32
  }
  func.func @transform_14(%arg0: i32) -> (i32, i32, i32) {
    %c0_i32 = arith.constant 0 : i32
    %c0_i32_0 = arith.constant 0 : i32
    %c0_i32_1 = arith.constant 0 : i32
    return %arg0, %c0_i32, %c0_i32_0 : i32, i32, i32
  }
  func.func @transform_15(%arg0: i32) -> (i32, i32, i32) {
    %c0_i32 = arith.constant 0 : i32
    %c0_i32_0 = arith.constant 0 : i32
    %c0_i32_1 = arith.constant 0 : i32
    %c0_i32_2 = arith.constant 0 : i32
    return %c0_i32, %c0_i32_0, %c0_i32_1 : i32, i32, i32
  }
}

</mosaic_0001>

<bundles_post_ra>
// kernel: tpu_custom_call.1
= control target key start
LH: loop header
LB: loop body
LE: loop exit
PB: predicated region body
PF: predicated region fallthrough
CT: control target
= control target key end

     0   :  { %s2052_s0 = inlined_call_operand.<no memory space> [shape: s32[1], index: 0, kind: input, shape index: {}]   ;;  %s2053_s1 = inlined_call_operand.vmem [shape: f32[8,8,16], index: 1, kind: input, shape index: {}]   ;;  %s2054_s2 = inlined_call_operand.vmem [shape: f32[8,8,128], index: 2, kind: input, shape index: {}]   ;;  %s2055_s3 = inlined_call_operand.hbm [shape: f32[2,8,32], index: 3, kind: input, shape index: {}, may-alias: {3,15}]   ;;  %s2056_s4 = inlined_call_operand.vmem [shape: f32[300,1,32], index: 4, kind: input, shape index: {}]   ;;  %s2057_s5 = inlined_call_operand.vmem [shape: f32[16,32], index: 5, kind: input, shape index: {}]   ;;  %s2058_s6 = inlined_call_operand.vmem [shape: f32[1,32], index: 6, kind: input, shape index: {}]   ;;  %s2059_s7 = inlined_call_operand.vmem [shape: f32[1,32], index: 7, kind: input, shape index: {}]   ;;  %s2060_s8 = inlined_call_operand.vmem [shape: f32[1,32], index: 8, kind: input, shape index: {}]   ;;  %s2061_s9 = inlined_call_operand.vmem [shape: f32[2,32,128], index: 9, kind: input, shape index: {}]   ;;  %s2062_s10 = inlined_call_operand.vmem [shape: f32[2,32,128], index: 10, kind: input, shape index: {}]   ;;  %s2063_s11 = inlined_call_operand.vmem [shape: f32[2,1,128], index: 11, kind: input, shape index: {}]   ;;  %s2064_s12 = inlined_call_operand.vmem [shape: f32[32,256], index: 12, kind: input, shape index: {}]   ;;  %s2065_s13 = inlined_call_operand.vmem [shape: f32[1,256], index: 13, kind: input, shape index: {}]   ;;  %s2066_s14 = inlined_call_operand.hbm [shape: f32[8,8,384], index: 14, kind: output, shape index: {0}]   ;;  %s2067_s15 = inlined_call_operand.hbm [shape: f32[2,8,32], index: 15, kind: output, shape index: {1}, may-alias: {3,15}]  }
   0x1   :  { %2077 = sst [smem:[#allocation16_spill]] %s2053_s1 }
   0x2   :  { %2078 = sst [smem:[#allocation17_spill]] %s2054_s2 }
   0x3   :  { %2079 = sst [smem:[#allocation18_spill]] %s2055_s3 }
   0x4   :  { %2080 = sst [smem:[#allocation19_spill]] %s2057_s5 }
   0x5   :  { %21 = sst [smem:[#allocation2]] %s2052_s0 }
   0x6   :  { %22 = vsyncpa [#allocation4], 0 }
   0x7   :  { %23 = vsyncpa [#allocation5], 0 }
   0x8   :  { %25 = vsyncpa [#allocation5 + $0x1], 0 }
   0x9   :  { %26 = vsyncpa [#allocation8], 0  ;;  %s1732_s20 = smov 0   ;;  %s1734_s21 = smov 0  }
   0xa   :  { %s1736_s22 = smov 0   ;;  %s1738_s23 = smov 0  }
   0xb LB: > { %2081 = sst [smem:[#allocation12_spill]] %s1630_s22  ;;  %s1753_s0 = sadd.s32 4294967295, %s1634_s23   ;;  %s1634_s23 = sphi %s1738_s23, %s2106_s23   ;;  %s1630_s22 = sphi %s1736_s22, %s2108_s22   ;;  %s1626_s21 = sphi %s1734_s21, %s2110_s21   ;;  %s1622_s20 = sphi %s1732_s20, %s2109_s20  }
   0xc   : > { %s1279_s24 = sadd.s32 4294967294, %s1634_s23   ;;  %s1757_s25 = sadd.s32 1, %s1634_s23  }
   0xd   : > { %2082 = sst [smem:[#allocation13_spill]] %s1757_s25  ;;  %s343_s26 = sadd.s32 1, %s1630_s22 }
   0xe   : > { %s340_s27 = ssub.s32 %s1634_s23, %s1757_s25  ;;  %p353_p0 = scmp.ne.s32.totalorder %s1630_s22, %s1626_s21 }
   0xf   : > { %p341_p1 = scmp.eq.s32.totalorder %s340_s27, 0  ;;  %p2072_p2 = scmp.eq.s32.totalorder %s1753_s0, 7 }
  0x10   : > { %p359_p3 = scmp.ne.s32.totalorder %s1626_s21, %s1622_s20  ;;  %p360_p4 = scmp.eq.s32.totalorder %s1279_s24, 7 }
  0x11   : > { %s1768_s28 = scalar_select %p341_p1, %s1630_s22, %s343_s26  }
  0x12   : > { %p1772_p5 = por %p2072_p2, %p353_p0  ;;  %p1776_p6 = por %p360_p4, %p359_p3 }
  0x13   : > { %2083 = sst [smem:[#allocation14_spill]] %s1768_s28  ;;  %p1280_p7 = scmp.ge.s32.totalorder %s1634_s23, 1 }
  0x14   : > { %s2084_s29 = scalar_select %p1772_p5, 1, 0 }
  0x15   : > { %s2085_s30 = scalar_select %p1776_p6, 1, 0 }
  0x16   : > { %p388_p8 = scmp.lt.s32.totalorder %s1634_s23, 9  ;;  %p2073_p10 = scmp.eq.s32.totalorder %s1753_s0, 0 }
  0x17   : > { %2086 = sst [smem:[#allocation15_spill]] %s2085_s30  ;;  %s1636_s17 = smov [#allocation3]  }
  0x18   : > { %p1784_p11 = pnand %p1280_p7, %p388_p8  ;;  %s403_s18 = sshll.u32 %s1636_s17, 4  ;;  %s404_s18 = int_to_ptr.vmem [resolvable:$true] %s403_s18 }
  0x19   : > { %s2089_s3 = sld [smem:[#allocation18_spill]] }
  0x1a   : > { %s2087_s16 = scalar_select %p1784_p11, 1, 0 }
  0x1b   : > { %p1437_p12 = pneg %p1784_p11 }
  0x1d   : > { %p1792_p13 = pnand %p2073_p10, %p1437_p12 }
  0x1f   : > { %s1510_s27 = scalar_lea.hbm %s2089_s3, 256  ;;  %p1512_p1 = pneg %p1792_p13 }
  0x20   : > { %p1511_p0 = scmp.ne.s32.totalorder %s2089_s3, %s1510_s27  ;;  %p1517_p7 = scmp.lt.u32.totalorder %s1510_s27, %s2089_s3 }
  0x22   : > { %p1513_p3 = pnand %p1512_p1, %p1511_p0 }
  0x24   : > { %p1514_p4 = pneg %p1513_p3 }
  0x26   : > { %p1519_p8 = pnand %p1517_p7, %p1514_p4 }
  0x28   : > { %1522 = shalt.err (!%p1519_p8)
}
  0x29   : > { %s1523_s30 = scalar_lea.vmem %s404_s18, 256  ;;  %p1531_p10 = scmp.lt.s32.totalorder %s404_s18, %s404_s18 }
  0x2a   : > { %p1524_p12 = scmp.ne.s32.totalorder %s404_s18, %s1523_s30  ;;  %p1532_p6 = scmp.lt.s32.totalorder %s1523_s30, %s1523_s30 }
  0x2c   : > { %p1526_p2 = pnand %p1524_p12, %p1512_p1  ;;  %p1533_p5 = por %p1532_p6, %p1531_p10 }
  0x2e   : > { %p1527_p9 = pneg %p1526_p2 }
  0x30   : > { %p1534_p11 = pnand %p1533_p5, %p1527_p9 }
  0x32   : > { %1537 = shalt.err (!%p1534_p11)
}
  0x33   : > { %s1637_s22 = smov 128   ;;  %s1638_s28 = smov 8  }
  0x34   : > { %1440 = dma.hbm_to_vmem [thread:$0]  (!%p1792_p13), %s2089_s3, 256, %s404_s18, [#allocation4], %s1637_s22, %s1637_s22, %s1638_s28  }
  0x35   : > { %p2090_p0 = scmp.ne.s32.totalorder %s2087_s16, 0 }
  0x36   : > { %p2091_p3 = scmp.eq.s32.totalorder (!%p2090_p0), %s1753_s0, 0 }
  0x37   : > { %463 = sbr.rel (%p2090_p0) target bundleno = 1715 (0x6b3), region = 76 }
  0x3e   : > { %1609 = dma.done.wait (%p2091_p3), [#allocation4], 256   ;;  %p2092_p2 = pmov %p2091_p3 }
  0x3f   : > { %s2076_s25 = sand.u32 1, %s1626_s21   ;;  %p514_p5 = scmp.lt.s32.totalorder %s1753_s0, 7 }
  0x40   : > { %1611 = vsyncadd (%p2092_p2), [#allocation4], 4294967040  ;;  %s1425_s30 = smul.u32 24, %s2076_s25  ;;  %s2093_s1 = sld [smem:[#allocation16_spill]] }
  0x41   : > { %s515_s19 = scalar_select %p514_p5, %s1753_s0, 7 }
  0x42   : > { %s2094_s2 = sld [smem:[#allocation17_spill]]  ;;  %s1831_s26 = scalar_lea.vmem [#allocation6], %s1425_s30 }
  0x43   : > { %s1285_s27 = sshll.u32 %s515_s19, 3  ;;  %p2095_p6 = scmp.ne.s32.totalorder %s1753_s0, 0 }
  0x44   : > { %v526_v0 = vld [vmem:[#allocation3] sm:$0xff] (!%p2095_p6)  ;;  %vm528_vm0 = vcmask (!%p2095_p6), 261120   ;;  %v527_v1 = vld [vmem:[#allocation3 + $0x8] sm:$0xff] (!%p2095_p6) }
  0x45   : > { %525 = sbr.rel (%p2095_p6) target bundleno = 76 (0x4c), region = 84  ;;  %529 = vst.msk [vmem:[#allocation7] sm:$0xff] (!%p2095_p6), %vm528_vm0, %v526_v0  ;;  %530 = vst.msk [vmem:[#allocation7 + $0x8] sm:$0xff] (!%p2095_p6), %vm528_vm0, %v527_v1 }
  0x46   : > { %s517_s16 = scalar_lea.vmem %s2093_s1, %s1285_s27 }
  0x48   : > { %s1829_s24 = scalar_lea.vmem %s2094_s2, %s1285_s27 }
  0x4c PF: > { %s2096_s5 = sld [smem:[#allocation19_spill]]  ;;  %v1639_v4 = vmov 0.0|0.0   ;;  %vm1640_vm1 = vmmov 0   ;;  %v1641_v6 = vmov 0.0   ;;  %v531_v7 = vld [vmem:[%s517_s16] sm:$0xff]  ;;  %vm542_vm2 = vcmask 130048  }
  0x4d   : > { %1390 = vmatprep.subr.bf16.mxu0 %v1639_v4  ;;  %1343 = vmatprep.mubr.msk.f32.mxu0 %vm1640_vm1, %v1641_v6  ;;  %v1288_v8 = vld [vmem:[%s2058_s6] ss:$0 sm:$0xff]  ;;  %vm616_vm3 = vcmask 261120   ;;  %v667_v19 = vld [vmem:[%s2062_s10 + $0x8] sm:$0xff]  ;;  %v668_v24 = vld [vmem:[%s2062_s10 + $0x10] sm:$0xff]  ;;  %s650_s19 = sld [smem:[#allocation2]] }
  0x4e   : > { %1393 = vmatprep.subr.bf16.mxu1 %v1639_v4  ;;  %1354 = vmatprep.mubr.msk.f32.mxu1 %vm1640_vm1, %v1641_v6  ;;  %v666_v18 = vld [vmem:[%s2062_s10] sm:$0xff]  ;;  %v663_v22 = vld [vmem:[%s2061_s9 + $0x8] sm:$0xff]  ;;  %v669_v25 = vld [vmem:[%s2062_s10 + $0x18] sm:$0xff]  ;;  %s1643_s30 = smov 64   ;;  %s2097_s16 = sand.u32 1, %s1626_s21  }
  0x4f   : > { %v1394_v20 = vpack.c.bf16 %v667_v19, %v666_v18  ;;  %v662_v21 = vld [vmem:[%s2061_s9] sm:$0xff]  ;;  %v1397_v26 = vpack.c.bf16 %v669_v25, %v668_v24  ;;  %v664_v27 = vld [vmem:[%s2061_s9 + $0x10] sm:$0xff]  ;;  %v665_v28 = vld [vmem:[%s2061_s9 + $0x18] sm:$0xff]  ;;  %p2098_p10 = scmp.ne.s32.totalorder %s2084_s29, 0 }
  0x50   : > { %v1400_v23 = vpack.c.bf16 %v663_v22, %v662_v21  ;;  %v1403_v29 = vpack.c.bf16 %v665_v28, %v664_v27  ;;  %v1301_v30 = vld [vmem:[%s2062_s10 + $0x20] sm:$0xff]  ;;  %v1302_v31 = vld [vmem:[%s2062_s10 + $0x28] sm:$0xff]  ;;  %v1303_v34 = vld [vmem:[%s2062_s10 + $0x30] sm:$0xff] }
  0x51   : > { %1395 = vmatpush3.bf16.msra.mxu1 %v1394_v20  ;;  %v1887_v32 = vld [vmem:[#allocation7] sm:$0xff]  ;;  %v1406_v33 = vpack.c.bf16 %v1302_v31, %v1301_v30  ;;  %v1304_v35 = vld [vmem:[%s2062_s10 + $0x38] sm:$0xff]  ;;  %v858_v37 = vld [vmem:[#allocation7 + $0x8] sm:$0xff] }
  0x52   : > { %v533_v2 = vld [vmem:[%s2096_s5] sm:$0xff]  ;;  %v534_v3 = vld [vmem:[%s2096_s5 + $0x8] sm:$0xff]  ;;  %1396 = vmatprep.subr.bf16.mxu1 %v1639_v4  ;;  %v1409_v36 = vpack.c.bf16 %v1304_v35, %v1303_v34  ;;  %v1299_v54 = vld [vmem:[%s2061_s9 + $0x30] sm:$0xff]  ;;  %s1642_s5 = smov 32  }
  0x53   : > { %v1391_v5 = vpack.c.bf16 %v534_v3, %v533_v2  ;;  %v1290_v42 = vld [vmem:[%s2059_s7] ss:$0 sm:$0xff]  ;;  %s651_s25 = sadd.s32 %s1753_s0, %s650_s19  ;;  %v1298_v48 = vld [vmem:[%s2061_s9 + $0x28] sm:$0xff]  ;;  %v1300_v55 = vld [vmem:[%s2061_s9 + $0x38] sm:$0xff]  ;;  %s1644_s19 = smov 96  }
  0x54   : > { %v1291_v44 = vld [vmem:[%s2060_s8] ss:$0 sm:$0xff]  ;;  %s652_s22 = scalar_lea.vmem %s2056_s4, %s651_s25  ;;  %v1415_v56 = vpack.c.bf16 %v1300_v55, %v1299_v54  ;;  %v1308_v1 = vld [vmem:[%s2063_s11 + $0x1] ss:$0 sm:$0xff]  ;;  %v1059_v18 = vld [vmem:[%s2064_s12 + $0x28] sm:$0xff] }
  0x55   : > { %1392 = vmatpush3.bf16.msra.mxu0 %v1391_v5  ;;  %1398 = vmatpush3.bf16.msra.mxu1 %v1397_v26  ;;  %v1297_v47 = vld [vmem:[%s2061_s9 + $0x20] sm:$0xff]  ;;  %v1061_v19 = vld [vmem:[%s2064_s12 + $0x38] sm:$0xff] }
  0x56   : > { %1399 = vmatprep.subr.bf16.mxu0 %v1639_v4  ;;  %1405 = vmatprep.subr.bf16.mxu1 %v1639_v4  ;;  %v1292_v50 = vld [vmem:[%s652_s22] ss:$0 sm:$0xff]  ;;  %v1412_v52 = vpack.c.bf16 %v1298_v48, %v1297_v47  ;;  %v1421_v21 = vpack.c.bf16 %v1061_v19, %v1059_v18  ;;  %s1156_s22 = scalar_lea.sflag [#allocation5], %s2097_s16 }
  0x57   : > { %v1058_v22 = vld [vmem:[%s2064_s12 + $0x20] sm:$0xff] }
  0x58   : > { %1344 = vmatmul.mubr.msk.f32.vlgmr.msra.gmra.mrb[0].mxu0 %vm542_vm2, %v531_v7  ;;  %1355 = vmatmul.mubr.msk.f32.vlgmr.msra.gmra.mrb[0].mxu1 %vm616_vm3, %v1887_v32  ;;  %v1062_v48 = vld [vmem:[%s2065_s13] sm:$0x3] }
  0x59   : > { %1365 = vmatprep.mubr.msk.f32.mxu0 %vm1640_vm1, %v1641_v6  ;;  %1401 = vmatpush3.bf16.msra.mxu0 %v1400_v23  ;;  %v1060_v23 = vld [vmem:[%s2064_s12 + $0x30] sm:$0xff] }
  0x5a   : > { %1402 = vmatprep.subr.bf16.mxu0 %v1639_v4  ;;  %1407 = vmatpush3.bf16.msra.mxu1 %v1406_v33  ;;  %v1423_v25 = vpack.c.bf16 %v1060_v23, %v1058_v22  ;;  %v1295_v33 = vld [vmem:[%s2063_s11] ss:$0 sm:$0xff] }
  0x5b   : > { %1376 = vmatprep.mubr.msk.f32.mxu1 %vm1640_vm1, %v1641_v6  ;;  %1408 = vmatprep.subr.bf16.mxu1 %v1639_v4 }
  0x5d   : > { %1404 = vmatpush3.bf16.msra.mxu0 %v1403_v29 }
  0x5e   : > { %1411 = vmatprep.subr.bf16.mxu0 %v1639_v4  ;;  %1410 = vmatpush3.bf16.msra.mxu1 %v1409_v36 }
  0x61   : > { %1377 = vmatmul.mubr.msk.f32.vlgmr.msra.gmra.mrb[2].mxu1 %vm616_vm3, %v858_v37 }
  0x62   : > { %1140 = vmatprep.mubr.f32.mxu1 %v1641_v6 }
 0x12b   : > { %v612_v9 = vpop.f32.mrb[0].mxu0  ;;  %v739_v57 = vpop.f32.mrb[0].mxu1 }
 0x12c   : > { %v613_v10 = vadd.f32 %v1288_v8, %v612_v9  ;;  %v1345_v11 = vpop.f32.mrb[1].mxu0  ;;  %v1356_v58 = vpop.f32.mrb[1].mxu1 }
 0x12e   : > { %v617_v12 = vsel %vm616_vm3, %v613_v10, 0.0 }
 0x12f   : > { %618 = vadd.xlane.f32.xlu0 %v617_v12 }
 0x134   : > { %v938_v59 = vpop.f32.mrb[2].mxu1 }
 0x135   : > { %v1378_v60 = vpop.f32.mrb[3].mxu1 }
 0x1bc   : > { %v619_v13 = vpop.xlane.xlu0 %618 }
 0x1bd   : > { %v621_v14 = vmul.f32 0.03125, %v619_v13  ;;  %v1055_v13 = vld [vmem:[%s2064_s12 + $0x8] sm:$0xff] }
 0x1bf   : > { %v622_v15 = vsub.f32 %v613_v10, %v621_v14  ;;  %v1057_v14 = vld [vmem:[%s2064_s12 + $0x18] sm:$0xff] }
 0x1c1   : > { %v623_v16 = vmul.f32 %v622_v15, %v622_v15 }
 0x1c3   : > { %v624_v17 = vsel %vm616_vm3, %v623_v16, 0.0  ;;  %v1417_v16 = vpack.c.bf16 %v1057_v14, %v1055_v13 }
 0x1c4   : > { %625 = vadd.xlane.f32.xlu0 %v624_v17  ;;  %v1056_v17 = vld [vmem:[%s2064_s12 + $0x10] sm:$0xff] }
 0x1c5   : > { %1418 = vmatprep.subr.bf16.mxu1 %v1417_v16 }
 0x251   : > { %v626_v38 = vpop.xlane.xlu0 %625 }
 0x252   : > { %v627_v39 = vmul.f32 0.03125, %v626_v38 }
 0x254   : > { %v628_v40 = vadd.f32 1e-05, %v627_v39 }
 0x256   : > { %1494 = vrsqrt.f32 %v628_v40 }
 0x260   : > { %v1495_v41 = vpop.eup %1494 }
 0x261   : > { %v630_v43 = vmul.f32 %v1495_v41, %v622_v15  ;;  %v1054_v15 = vld [vmem:[%s2064_s12] sm:$0xff] }
 0x262   : > { %v1419_v20 = vpack.c.bf16 %v1056_v17, %v1054_v15 }
 0x263   : > { %v638_v45 = vmul.f32 %v1290_v42, %v630_v43 }
 0x264   : > { %1420 = vmatpush1.bf16.msra.mxu1 %v1419_v20 }
 0x265   : > { %v646_v46 = vadd.f32 %v1291_v44, %v638_v45  ;;  %1422 = vmatprep.subr.bf16.mxu1 %v1421_v21  ;;  %v1064_v45 = vlaneseq }
 0x267   : > { %vm647_vm4 = vcmp.gt.f32.partialorder %v646_v46, 0.0  ;;  %v648_v49 = vmul.f32 0.2, %v646_v46 }
 0x268   : > { %1424 = vmatpush1.bf16.msra.mxu1 %v1423_v25 }
 0x269   : > { %v649_v51 = vsel %vm647_vm4, %v646_v46, %v648_v49  ;;  %v1065_v46 = vshrl.u32 %v1064_v45, 7 }
 0x26a   : > { %v660_v53 = vadd.f32 %v1292_v50, %v649_v51 }
 0x26b   : > { %v1066_v47 = vsub.s32 0, %v1065_v46  ;;  %v1070_v49 = vsub.s32 1, %v1065_v46 }
 0x26c   : > { %1366 = vmatmul.mubr.msk.f32.vlgmr.msra.gmra.mrb[2].mxu0 %vm616_vm3, %v660_v53 }
 0x26d   : > { %1413 = vmatpush3.bf16.msra.mxu0 %v1412_v52  ;;  %1387 = vmatprep.mubr.msk.f32.mxu0 %vm1640_vm1, %v1641_v6  ;;  %v1067_v50 = vrot.slane %v1062_v48, %v1066_v47  ;;  %v1071_v51 = vrot.slane %v1062_v48, %v1070_v49 }
 0x26e   : > { %1414 = vmatprep.subr.bf16.mxu0 %v1639_v4 }
 0x271   : > { %1416 = vmatpush3.bf16.msra.mxu0 %v1415_v56 }
 0x274   : > { %1388 = vmatmul.mubr.msk.f32.vlgmr.msra.gmra.mrb[4].mxu0 %vm616_vm3, %v660_v53 }
 0x33f   : > { %v812_v61 = vpop.f32.mrb[2].mxu0 }
 0x340   : > { %v813_v62 = vadd.f32 %v812_v61, %v739_v57  ;;  %v1367_v63 = vpop.f32.mrb[3].mxu0  ;;  %v532_v57 = vld [vmem:[%s1829_s24] sm:$0xff]  ;;  %s1645_s24 = smov [#allocation6]  }
 0x341   : > { %s1542_s18 = sshll.u32 %s1645_s24, 4  ;;  %s1543_s18 = int_to_ptr.vmem [resolvable:$false] %s1542_s18 }
 0x342   : > { %v823_v34 = vadd.f32 %v1295_v33, %v813_v62  ;;  %s1544_s17 = scalar_lea.vmem %s1543_s18, 768 }
 0x344   : > { %v1296_v35 = vmul.f32 -1.442695, %v823_v34 }
 0x347   : > { %v1008_v0 = vpop.f32.mrb[4].mxu0 }
 0x348   : > { %v1009_v2 = vadd.f32 %v1008_v0, %v938_v59  ;;  %v1389_v3 = vpop.f32.mrb[5].mxu0 }
 0x34a   : > { %v1020_v5 = vadd.f32 %v1308_v1, %v1009_v2 }
 0x34c   : > { %1028 = vrot.lane.b32.xlu1 %v1020_v5, %s1642_s5  ;;  %v1309_v4 = vmul.f32 -1.442695, %v1020_v5 }
 0x34e   : > { %1496 = vpow2.f32 %v1309_v4 }
 0x358   : > { %v1497_v6 = vpop.eup %1496 }
 0x359   : > { %v1024_v7 = vadd.f32 1.0, %v1497_v6 }
 0x35b   : > { %1498 = vrcp.f32 %v1024_v7 }
 0x365   : > { %v1499_v8 = vpop.eup %1498 }
 0x366   : > { %v1038_v27 = vsub.f32 1.0, %v1499_v8 }
 0x3be   : > { %v1029_v9 = vpop.permute.xlu1 %1028 }
 0x3bf   : > { %v1031_v10 = vmul.f32 %v1499_v8, %v1029_v9 }
 0x3c1   : > { %1033 = vrot.lane.b32.xlu1 %v1031_v10, %s1643_s30 }
 0x3c5   : > { %1044 = vrot.lane.b32.xlu1 %v858_v37, %s1642_s5 }
 0x433   : > { %v1034_v11 = vpop.permute.xlu1 %1033 }
 0x434   : > { %v1036_v12 = vadd.f32 %v1034_v11, %v1020_v5 }
 0x436   : > { %1500 = vtanh.f32 %v1036_v12 }
 0x437   : > { %v1045_v26 = vpop.permute.xlu1 %1044  ;;  %1502 = vpow2.f32 %v1296_v35 }
 0x438   : > { %v1047_v29 = vmul.f32 %v1499_v8, %v1045_v26 }
 0x440   : > { %v1501_v24 = vpop.eup %1500 }
 0x441   : > { %1040 = vrot.lane.b32.xlu0 %v1501_v24, %s1644_s19  ;;  %v1503_v36 = vpop.eup %1502 }
 0x442   : > { %v827_v37 = vadd.f32 1.0, %v1503_v36 }
 0x444   : > { %1504 = vrcp.f32 %v827_v37 }
 0x44e   : > { %v1969_v39 = vpop.eup %1504 }
 0x4b3   : > { %v1041_v28 = vpop.permute.xlu0 %1040 }
 0x4b4   : > { %v1043_v30 = vmul.f32 %v1041_v28, %v1038_v27 }
 0x4b6   : > { %v1048_v31 = vadd.f32 %v1047_v29, %v1043_v30 }
 0x4b8   : > { %1050 = vrot.lane.b32.xlu1 %v1048_v31, %s1644_s19 }
 0x4bc   : > { %831 = vrot.lane.b32.xlu1 %v823_v34, %s1642_s5 }
 0x52a   : > { %v1051_v38 = vpop.permute.xlu1 %1050 }
 0x52b   : > { %1053 = vst.msk [vmem:[#allocation7 + $0x8] sm:$0xff] %vm616_vm3, %v1051_v38  ;;  %1310 = vmatmul.mubr.msk.f32.vlgmr.msra.gmra.mrb[4].mxu1 %vm616_vm3, %v1051_v38 }
 0x52e   : > { %v832_v40 = vpop.permute.xlu1 %831 }
 0x52f   : > { %v834_v41 = vmul.f32 %v1969_v39, %v832_v40 }
 0x531   : > { %836 = vrot.lane.b32.xlu1 %v834_v41, %s1643_s30  ;;  %s1170_s30 = sshll.u32 %s1831_s26, 4  ;;  %s1171_s30 = int_to_ptr.vmem [resolvable:$true] %s1170_s30 }
 0x532   : > { %s1538_s28 = scalar_lea.vmem %s1171_s30, 384  ;;  %p1545_p1 = scmp.lt.s32.totalorder %s1171_s30, %s1543_s18 }
 0x533   : > { %p1539_p9 = scmp.ne.s32.totalorder %s1171_s30, %s1538_s28  ;;  %p1546_p4 = scmp.lt.s32.totalorder %s1544_s17, %s1538_s28 }
 0x535   : > { %p1540_p11 = pnand %p1539_p9, %p2098_p10  ;;  %p1547_p7 = por %p1546_p4, %p1545_p1 }
 0x537   : > { %p1541_p13 = pneg %p1540_p11 }
 0x539   : > { %p1548_p8 = pnand %p1547_p7, %p1541_p13 }
 0x5a3   : > { %v837_v42 = vpop.permute.xlu1 %836 }
 0x5a4   : > { %v839_v43 = vadd.f32 %v837_v42, %v823_v34 }
 0x5a6   : > { %1506 = vtanh.f32 %v839_v43 }
 0x5b0   : > { %v1507_v44 = vpop.eup %1506 }
 0x5b1   : > { %843 = vrot.lane.b32.xlu1 %v1507_v44, %s1644_s19 }
 0x5b5   : > { %847 = vrot.lane.b32.xlu1 %v1887_v32, %s1642_s5  ;;  %s1426_s5 = smul.u32 384, %s1753_s0 }
 0x5b7   : > { %s1988_s1 = scalar_lea.hbm %s2066_s14, %s1426_s5 }
 0x5fe   : > { %v1142_v52 = vpop.f32.mrb[4].mxu1 }
 0x5ff   : > { %v1143_v53 = vadd.f32 %v1142_v52, %v1067_v50  ;;  %v1144_v54 = vpop.f32.mrb[5].mxu1 }
 0x600   : > { %v1145_v55 = vadd.f32 %v1144_v54, %v1071_v51 }
 0x601   : > { %1153 = vst [vmem:[%s1831_s26 + $0x8] sm:$0xff] %v1143_v53 }
 0x602   : > { %v1147_v32 = vmul.f32 0.5, %v1145_v55  ;;  %1154 = vst [vmem:[%s1831_s26 + $0x10] sm:$0xff] %v1145_v55 }
 0x604   : > { %v1148_v56 = vmul.f32 1.442695, %v1147_v32 }
 0x606   : > { %1508 = vpow2.f32 %v1148_v56 }
 0x610   : > { %v1509_v58 = vpop.eup %1508 }
 0x611   : > { %v1150_v59 = vmul.f32 %v1509_v58, %v532_v57 }
 0x613   : > { %v1151_v60 = vadd.f32 %v1150_v59, %v1143_v53 }
 0x615   : > { %1152 = vst [vmem:[%s1831_s26] sm:$0xff] %v1151_v60 }
 0x616   : > { %1551 = shalt.err (!%p1548_p8)
}
 0x617   : > { %s1552_s26 = scalar_lea.hbm %s1988_s1, 384  ;;  %s1556_s5 = scalar_lea.hbm %s2066_s14, 3072 }
 0x618   : > { %p1553_p12 = scmp.ne.s32.totalorder %s1988_s1, %s1552_s26  ;;  %p1557_p2 = scmp.lt.u32.totalorder %s1988_s1, %s2066_s14 }
 0x619   : > { %p1558_p5 = scmp.lt.u32.totalorder %s1556_s5, %s1552_s26  ;;  %p1560_p9 = scmp.lt.u32.totalorder %s1552_s26, %s1988_s1 }
 0x61a   : > { %p1554_p0 = pnand %p1553_p12, %p2098_p10 }
 0x61b   : > { %p1559_p6 = por %p1558_p5, %p1557_p2 }
 0x61c   : > { %p1555_p3 = pneg %p1554_p0 }
 0x61d   : > { %p1561_p11 = por %p1560_p9, %p1559_p6 }
 0x61f   : > { %p1562_p13 = pnand %p1561_p11, %p1555_p3 }
 0x621   : > { %1565 = shalt.err (!%p1562_p13)
}
 0x622   : > { %1431 = dma.vmem_to_hbm [thread:$0]  (%p2098_p10), %s1171_s30, 384, %s1988_s1, %s1156_s22   ;;  %v841_v62 = vsub.f32 1.0, %v1969_v39 }
 0x623   : > { %v844_v61 = vpop.permute.xlu1 %843  ;;  %s1646_s16 = smov [#allocation7]   ;;  %p2099_p4 = scmp.eq.s32.totalorder %s1753_s0, 7 }
 0x624   : > { %v846_v0 = vmul.f32 %v844_v61, %v841_v62  ;;  %s1180_s28 = sshll.u32 %s1646_s16, 4  ;;  %s1181_s28 = int_to_ptr.vmem [resolvable:$true] %s1180_s28 }
 0x625   : > { %s1566_s29 = scalar_lea.vmem %s1181_s28, 256  ;;  %p1573_p8 = scmp.lt.s32.totalorder %s1181_s28, %s1181_s28 }
 0x626   : > { %p1567_p1 = scmp.ne.s32.totalorder %s1181_s28, %s1566_s29  ;;  %p1574_p12 = scmp.lt.s32.totalorder %s1566_s29, %s1566_s29 }
 0x627   : > { %v848_v63 = vpop.permute.xlu1 %847 }
 0x628   : > { %v850_v1 = vmul.f32 %v1969_v39, %v848_v63  ;;  %p1568_p10 = pnand %p1567_p1, %p2099_p4  ;;  %p1575_p0 = por %p1574_p12, %p1573_p8 }
 0x62a   : > { %v851_v2 = vadd.f32 %v850_v1, %v846_v0  ;;  %p1569_p7 = pneg %p1568_p10 }
 0x62c   : > { %853 = vrot.lane.b32.xlu0 %v851_v2, %s1644_s19  ;;  %p1576_p3 = pnand %p1575_p0, %p1569_p7 }
 0x69e   : > { %v854_v3 = vpop.permute.xlu0 %853 }
 0x69f   : > { %856 = vst.msk [vmem:[#allocation7] sm:$0xff] %vm616_vm3, %v854_v3 }
 0x6a0   : > { %1579 = shalt.err (!%p1576_p3)
}
 0x6a1   : > { %s1580_s19 = scalar_lea.hbm %s2067_s15, 256  ;;  %p2100_p5 = pmov %p2099_p4 }
 0x6a2   : > { %p1581_p2 = scmp.ne.s32.totalorder %s2067_s15, %s1580_s19  ;;  %p1586_p11 = scmp.lt.u32.totalorder %s1580_s19, %s2067_s15 }
 0x6a4   : > { %p1582_p6 = pnand %p1581_p2, %p2100_p5 }
 0x6a6   : > { %p1583_p9 = pneg %p1582_p6 }
 0x6a8   : > { %p1588_p13 = pnand %p1586_p11, %p1583_p9 }
 0x6aa   : > { %1591 = shalt.err (!%p1588_p13)
}
 0x6ab   : > { %s1647_s26 = smov 128   ;;  %s1648_s25 = smov 8  }
 0x6ac   : > { %p2101_p1 = pmov %p2099_p4 }
 0x6ae   : > { %1433 = dma.vmem_to_hbm [thread:$0]  (%p2101_p1), %s1181_s28, 256, %s2067_s15, [#allocation8], %s1647_s26, %s1647_s26, %s1648_s25  }
 0x6af   : > { %p2102_p4 = pmov %p2101_p1 }
 0x6b0   : > { %p2103_p10 = pmov %p2101_p1 }
 0x6b1   : > { %1613 = dma.done.wait (%p2102_p4), [#allocation8], 256  }
 0x6b2   : > { %1615 = vsyncadd (%p2103_p10), [#allocation8], 4294967040 }
 0x6b3 PF: > { %s2104_s3 = sld [smem:[#allocation15_spill]]  ;;  %p1449_p7 = scmp.ge.s32.totalorder %s1634_s23, 2 }
 0x6b4   : > { %s1199_s27 = sand.u32 1, %s1622_s20  }
 0x6b5   : > { %s1200_s16 = scalar_lea.sflag [#allocation5], %s1199_s27 }
 0x6b9   : > { %p2105_p8 = scmp.ne.s32.totalorder %s2104_s3, 0 }
 0x6bb   : > { %p1442_p12 = pnand %p1449_p7, %p2105_p8 }
 0x6bd   : > { %1617 = dma.done.wait (!%p1442_p12), %s1200_s16, 384  }
 0x6be   : > { %1619 = vsyncadd (!%p1442_p12), %s1200_s16, 4294966912  ;;  %s2106_s23 = sld [smem:[#allocation13_spill]]  ;;  %s2107_s29 = sld [smem:[#allocation12_spill]] }
 0x6bf   : > { %s2108_s22 = sld [smem:[#allocation14_spill]]  ;;  %s2109_s20 = smov %s1626_s21 }
 0x6c4   : > { %p29_p0 = scmp.ge.s32.totalorder %s2106_s23, 10   ;;  %s2110_s21 = smov %s2107_s29 }
 0x6c6   :  { %31 = sbr.rel (!%p29_p0) target bundleno = 11 (0xb), region = 136 }
 0x6cd   :  { %1205 = vsyncpa [#allocation4], 1 }
 0x6ce   :  { %1207 = vsyncpa [#allocation4 + $0x1], 1 }
 0x6cf   :  { %1208 = vsyncpa [#allocation5], 1 }
 0x6d0   :  { %1210 = vsyncpa [#allocation5 + $0x1], 1 }
 0x6d1   :  { %1211 = vsyncpa [#allocation8], 1 }

</bundles_post_ra>
